<compile_context>
chip_gen: v7x
topology: tpu7x:2x2x1
jax: 0.10.0
libtpu: 0.0.40
codegen_flags: <defaults>
</compile_context>

<pallas_src>
import functools

import jax
import jax.numpy as jnp
from jax import lax
from jax.experimental import pallas as pl
from jax.experimental.pallas import tpu as pltpu

LANES = 128
MAX_TILE_ROWS = 2048   # (2048,128) f32 block = 1 MiB per input per buffer
CHUNK_ROWS = 256       # in-kernel compute chunk: bounds VMEM intermediates


def _num_tensorcores_per_chip():
    """2-way split only on 2-TensorCore parts (v7x-class); 1 on v5e/v6e."""
    try:
        kind = jax.devices()[0].device_kind.lower()
    except Exception:
        return 1
    return 2 if ("v7" in kind or "7x" in kind) else 1


def _focal_sum_kernel(n_ref, x_ref, t_ref, out_ref, *,
                      alpha, gamma, tile_rows, blocks_per_split, chunk_rows):
    """Accumulate masked focal-loss partials of one (tile_rows,128) block into
    the resident (8,128) output block of the current split."""
    c = pl.program_id(0)   # split index ("parallel")
    i = pl.program_id(1)   # block index within split ("arbitrary", reduction)

    @pl.when(i == 0)
    def _():
        out_ref[...] = jnp.zeros_like(out_ref)

    n_valid = n_ref[0]
    block_off = (c * blocks_per_split + i) * (tile_rows * LANES)  # int32

    def accumulate_chunk(row_start, rows, chunk_off):
        x = x_ref[pl.ds(row_start, rows), :].astype(jnp.float32)
        t = t_ref[pl.ds(row_start, rows), :].astype(jnp.float32)

        # One exp(-|x|) shared by the stable softplus and the sigmoid.
        e = jnp.exp(-jnp.abs(x))
        inv = pl.reciprocal(1.0 + e, approx=False)       # exact: torch parity
        p = jnp.where(x >= 0.0, inv, e * inv)            # sigmoid(x)
        ce = jnp.maximum(x, 0.0) - x * t + jnp.log1p(e)  # BCE-with-logits
        m = p + t - 2.0 * p * t                          # == 1 - p_t
        loss = ce * m ** gamma                           # int gamma -> VPU mul
        if alpha >= 0:
            loss = ((1.0 - alpha) + (2.0 * alpha - 1.0) * t) * loss

        def add(v):
            out_ref[...] += v.reshape(rows // 8, 8, LANES).sum(axis=0)

        chunk_elems = rows * LANES

        # Interior chunks: fully valid -> unmasked accumulate (no iota work).
        @pl.when(chunk_off + chunk_elems <= n_valid)
        def _():
            add(loss)

        # Tail / out-of-range chunk: mask from the LOGICAL offset (delivered
        # data past the array edge is unspecified; the select zeroes it).
        @pl.when(chunk_off + chunk_elems > n_valid)
        def _():
            rid = lax.broadcasted_iota(jnp.int32, (rows, LANES), 0)
            lid = lax.broadcasted_iota(jnp.int32, (rows, LANES), 1)
            valid = (chunk_off + rid * LANES + lid) < n_valid
            add(jnp.where(valid, loss, 0.0))

    n_full = tile_rows // chunk_rows
    rem = tile_rows - n_full * chunk_rows   # multiple of 8 by construction

    if n_full > 0:
        def body(j, carry):
            start = pl.multiple_of(j * chunk_rows, chunk_rows)
            accumulate_chunk(start, chunk_rows,
                             block_off + j * (chunk_rows * LANES))
            return carry
        lax.fori_loop(0, n_full, body, 0, unroll=True)
    if rem > 0:
        accumulate_chunk(n_full * chunk_rows, rem,
                         block_off + n_full * chunk_rows * LANES)


def focal_loss(logits, targets, alpha=0.25, gamma=2, reduction="mean", *,
               num_splits=None):
    """JAX/Pallas equivalent of FocalLoss.forward ('mean' or 'sum').

    bf16 logits / bf16-or-int targets from the producer are encouraged (the
    f32 cast happens inside the kernel); no cast is added in this wrapper.
    """
    assert logits.shape == targets.shape
    if reduction == "none":
        # TODO(synk): 'none' would need an elementwise-output kernel; only the
        # reduced variants are implemented (module default is 'mean').
        raise NotImplementedError("reduction='none' not implemented in kernel")
    if reduction not in ("mean", "sum"):
        raise ValueError(f"Invalid reduction: {reduction}")

    n = int(logits.size)
    assert n > 0

    flat_x = jnp.ravel(logits)
    flat_t = jnp.ravel(targets)

    # Lane-dense (rows,128) layout.  Only the sub-(8*128) ragged tail is
    # padded (pad < 1024 elems; 0 for typical NCHW sizes) — large arrays are
    # NOT copied just to align to the tile/split size.
    padded_rows = pl.cdiv(pl.cdiv(n, LANES), 8) * 8
    pad = padded_rows * LANES - n
    if pad:
        flat_x = jnp.pad(flat_x, (0, pad))
        flat_t = jnp.pad(flat_t, (0, pad))
    x2 = flat_x.reshape(padded_rows, LANES)
    t2 = flat_t.reshape(padded_rows, LANES)

    tile_rows = min(MAX_TILE_ROWS, padded_rows)
    num_blocks = pl.cdiv(padded_rows, tile_rows)
    if num_splits is None:
        num_splits = _num_tensorcores_per_chip()
    num_splits = num_splits if num_blocks > 1 else 1
    blocks_per_split = pl.cdiv(num_blocks, num_splits)
    chunk_rows = min(CHUNK_ROWS, tile_rows)

    # In-kernel offsets are int32.
    assert num_splits * blocks_per_split * tile_rows * LANES < 2**31, (
        "focal_loss kernel supports < 2**31 elements")

    if isinstance(gamma, float) and gamma.is_integer():
        gamma = int(gamma)   # keep (1-p_t)**gamma a plain multiply

    kernel = functools.partial(
        _focal_sum_kernel,
        alpha=float(alpha), gamma=gamma, tile_rows=tile_rows,
        blocks_per_split=blocks_per_split, chunk_rows=chunk_rows)

    last_block = num_blocks - 1

    def data_index_map(c, i, n_s):
        # Clamp so a fully-out-of-range duplicate block (possible when the
        # block count isn't a multiple of num_splits) still DMAs in-bounds
        # memory; the kernel masks it out from the logical offset.
        return (jnp.minimum(c * blocks_per_split + i, last_block), 0)

    data_spec = pl.BlockSpec((tile_rows, LANES), data_index_map)
    n_arr = jnp.asarray([n], dtype=jnp.int32)

    partials = pl.pallas_call(
        kernel,
        out_shape=jax.ShapeDtypeStruct((num_splits * 8, LANES), jnp.float32),
        grid_spec=pltpu.PrefetchScalarGridSpec(
            num_scalar_prefetch=1,
            grid=(num_splits, blocks_per_split),
            in_specs=[data_spec, data_spec],
            out_specs=pl.BlockSpec((8, LANES), lambda c, i, n_s: (c, 0)),
        ),
        compiler_params=pltpu.CompilerParams(
            dimension_semantics=("parallel", "arbitrary"),
            vmem_limit_bytes=32 * 1024 * 1024,
        ),
    )(n_arr, x2, t2)

    total = jnp.sum(partials)
    if reduction == "mean":
        return total / jnp.float32(n)
    return total


def _focal_loss_ref(logits, targets, alpha=0.25, gamma=2, reduction="mean"):
    # pure-JAX reference for sanity checking
    x = logits.astype(jnp.float32)
    t = targets.astype(jnp.float32)
    p = jax.nn.sigmoid(x)
    ce = jnp.maximum(x, 0.0) - x * t + jnp.log1p(jnp.exp(-jnp.abs(x)))
    p_t = p * t + (1 - p) * (1 - t)
    loss = ce * (1 - p_t) ** gamma
    alpha_t = alpha * t + (1 - alpha) * (1 - t)
    loss = alpha_t * loss
    return jnp.mean(loss) if reduction == "mean" else jnp.sum(loss)


if __name__ == "__main__":
    key = jax.random.PRNGKey(0)

    def _check(tag, shape, dtype=jnp.float32, reduction="mean", **kw):
        k1, k2 = jax.random.split(jax.random.fold_in(key, tag))
        logits = (jax.random.normal(k1, shape, dtype=jnp.float32) * 2.0
                  ).astype(dtype)
        targets = (jax.random.uniform(k2, shape) > 0.5).astype(dtype)
        out = focal_loss(logits, targets, alpha=0.25, gamma=2,
                         reduction=reduction, **kw)
        out = jax.block_until_ready(out)
        ref = _focal_loss_ref(logits, targets, reduction=reduction)
        assert jnp.allclose(out, ref, rtol=2e-4, atol=1e-6), (shape, out, ref)

    # primary: segmentation-style (B, C, H, W), single small block
    _check(0, (2, 4, 16, 16))
    # ragged (<128-elem) tail -> masked tail chunk
    _check(1, (2, 3, 7, 5))
    # single larger block, multiple in-kernel compute chunks
    _check(2, (3, 4, 128, 128))
    # bf16 inputs (in-kernel cast path)
    _check(3, (2, 4, 16, 16), dtype=jnp.bfloat16)
    # reduction='sum'
    _check(4, (2, 4, 32, 32), reduction="sum")
    # multi-block: partial edge block + forced 2-way split with a fully
    # out-of-range duplicate block (3 data blocks over a 2x2 grid)
    _check(5, (5, 2, 250, 250), num_splits=2)

    print("KERNEL_OK")
</pallas_src>

<mosaic_0001>
module attributes {stable_mosaic.version = 11 : i64} {
  func.func @_focal_sum_kernel(%arg0: i32, %arg1: i32, %arg2: memref<1xi32, #tpu.memory_space<smem>>, %arg3: memref<16x128xf32, #tpu.memory_space<vmem>>, %arg4: memref<16x128xf32, #tpu.memory_space<vmem>>, %arg5: memref<8x128xf32, #tpu.memory_space<vmem>>) attributes {dimension_semantics = [#tpu.dimension_semantics<parallel>, #tpu.dimension_semantics<arbitrary>], iteration_bounds = array<i64: 1, 1>, scalar_prefetch = 1 : i64, scratch_operands = 0 : i64, tpu.core_type = #tpu.core_type<tc>, window_params = [{transform_indices = @transform_0, window_bounds = array<i64: 16, 128>}, {transform_indices = @transform_1, window_bounds = array<i64: 16, 128>}, {transform_indices = @transform_2, window_bounds = array<i64: 8, 128>}]} {
    %c0_i32 = arith.constant 0 : i32
    %0 = arith.cmpi eq, %arg1, %c0_i32 : i32
    %1 = arith.extui %0 : i1 to i32
    %c0_i32_0 = arith.constant 0 : i32
    %2 = arith.cmpi ne, %1, %c0_i32_0 : i32
    scf.if %2 {
      %cst_16 = arith.constant 0.000000e+00 : f32
      %52 = vector.broadcast %cst_16 : f32 to vector<8x128xf32>
      %c0_17 = arith.constant 0 : index
      %c0_18 = arith.constant 0 : index
      %53 = vector.load %arg5[%c0_17, %c0_18] : memref<8x128xf32, #tpu.memory_space<vmem>>, vector<8x128xf32>
      tpu.vector_store %arg5[%c0_17, %c0_18], %52 {strides = array<i32>} : memref<8x128xf32, #tpu.memory_space<vmem>>, vector<8x128xf32>,
    } else {
    }
    %c0 = arith.constant 0 : index
    %3 = memref.load %arg2[%c0] : memref<1xi32, #tpu.memory_space<smem>>
    %c1_i32 = arith.constant 1 : i32
    %4 = arith.muli %arg0, %c1_i32 : i32
    %5 = arith.addi %4, %arg1 : i32
    %c2048_i32 = arith.constant 2048 : i32
    %6 = arith.muli %5, %c2048_i32 : i32
    %c0_i32_1 = arith.constant 0 : i32
    %c16_i32 = arith.constant 16 : i32
    %7 = arith.muli %c0_i32_1, %c16_i32 : i32
    %8 = tpu.assume_multiple %7, 16 : i32
    %c2048_i32_2 = arith.constant 2048 : i32
    %9 = arith.muli %c0_i32_1, %c2048_i32_2 : i32
    %10 = arith.addi %6, %9 : i32
    %11 = arith.index_cast %8 : i32 to index
    %c0_3 = arith.constant 0 : index
    %12 = vector.load %arg3[%11, %c0_3] : memref<16x128xf32, #tpu.memory_space<vmem>>, vector<16x128xf32>
    %13 = arith.index_cast %8 : i32 to index
    %c0_4 = arith.constant 0 : index
    %14 = vector.load %arg4[%13, %c0_4] : memref<16x128xf32, #tpu.memory_space<vmem>>, vector<16x128xf32>
    %15 = math.absf %12 : vector<16x128xf32>
    %cst = arith.constant 0.000000e+00 : f32
    %16 = vector.broadcast %cst : f32 to vector<16x128xf32>
    %17 = arith.subf %16, %15 : vector<16x128xf32>
    %18 = math.exp %17 : vector<16x128xf32>
    %cst_5 = arith.constant 1.000000e+00 : f32
    %19 = vector.broadcast %cst_5 : f32 to vector<16x128xf32>
    %20 = arith.addf %19, %18 : vector<16x128xf32>
    %21 = tpu.reciprocal %20 : vector<16x128xf32> -> vector<16x128xf32>
    %cst_6 = arith.constant 0.000000e+00 : f32
    %22 = vector.broadcast %cst_6 : f32 to vector<16x128xf32>
    %23 = arith.cmpf oge, %12, %22 : vector<16x128xf32>
    %24 = arith.mulf %18, %21 : vector<16x128xf32>
    %25 = arith.select %23, %21, %24 : vector<16x128xi1>, vector<16x128xf32>
    %cst_7 = arith.constant 0.000000e+00 : f32
    %26 = vector.broadcast %cst_7 : f32 to vector<16x128xf32>
    %27 = arith.maximumf %12, %26 : vector<16x128xf32>
    %28 = arith.mulf %12, %14 : vector<16x128xf32>
    %29 = arith.subf %27, %28 : vector<16x128xf32>
    %30 = math.log1p %18 : vector<16x128xf32>
    %31 = arith.addf %29, %30 : vector<16x128xf32>
    %32 = arith.addf %25, %14 : vector<16x128xf32>
    %cst_8 = arith.constant 2.000000e+00 : f32
    %33 = vector.broadcast %cst_8 : f32 to vector<16x128xf32>
    %34 = arith.mulf %33, %25 : vector<16x128xf32>
    %35 = arith.mulf %34, %14 : vector<16x128xf32>
    %36 = arith.subf %32, %35 : vector<16x128xf32>
    %37 = arith.mulf %36, %36 : vector<16x128xf32>
    %38 = arith.mulf %31, %37 : vector<16x128xf32>
    %cst_9 = arith.constant -5.000000e-01 : f32
    %39 = vector.broadcast %cst_9 : f32 to vector<16x128xf32>
    %40 = arith.mulf %39, %14 : vector<16x128xf32>
    %cst_10 = arith.constant 7.500000e-01 : f32
    %41 = vector.broadcast %cst_10 : f32 to vector<16x128xf32>
    %42 = arith.addf %41, %40 : vector<16x128xf32>
    %43 = arith.mulf %42, %38 : vector<16x128xf32>
    %c2048_i32_11 = arith.constant 2048 : i32
    %44 = arith.addi %10, %c2048_i32_11 : i32
    %45 = arith.cmpi sle, %44, %3 : i32
    %46 = arith.extui %45 : i1 to i32
    %c0_i32_12 = arith.constant 0 : i32
    %47 = arith.cmpi ne, %46, %c0_i32_12 : i32
    scf.if %47 {
      %c0_16 = arith.constant 0 : index
      %c0_17 = arith.constant 0 : index
      %52 = vector.load %arg5[%c0_16, %c0_17] : memref<8x128xf32, #tpu.memory_space<vmem>>, vector<8x128xf32>
      %53 = vector.shape_cast %43 : vector<16x128xf32> to vector<2x8x128xf32>
      %cst_18 = arith.constant dense<0.000000e+00> : vector<8x128xf32>
      %54 = vector.multi_reduction <add>, %53, %cst_18 [0] : vector<2x8x128xf32> to vector<8x128xf32>
      %55 = arith.addf %52, %54 : vector<8x128xf32>
      %c0_19 = arith.constant 0 : index
      %c0_20 = arith.constant 0 : index
      %56 = vector.load %arg5[%c0_19, %c0_20] : memref<8x128xf32, #tpu.memory_space<vmem>>, vector<8x128xf32>
      tpu.vector_store %arg5[%c0_19, %c0_20], %55 {strides = array<i32>} : memref<8x128xf32, #tpu.memory_space<vmem>>, vector<8x128xf32>,
    } else {
    }
    %c2048_i32_13 = arith.constant 2048 : i32
    %48 = arith.addi %10, %c2048_i32_13 : i32
    %49 = arith.cmpi sgt, %48, %3 : i32
    %50 = arith.extui %49 : i1 to i32
    %c0_i32_14 = arith.constant 0 : i32
    %51 = arith.cmpi ne, %50, %c0_i32_14 : i32
    scf.if %51 {
      %52 = tpu.iota {dimensions = array<i32: 0>} : vector<16x128xi32>
      %53 = tpu.iota {dimensions = array<i32: 1>} : vector<16x128xi32>
      %c128_i32 = arith.constant 128 : i32
      %54 = vector.broadcast %c128_i32 : i32 to vector<16x128xi32>
      %55 = arith.muli %52, %54 : vector<16x128xi32>
      %56 = vector.broadcast %10 : i32 to vector<16x128xi32>
      %57 = arith.addi %56, %55 : vector<16x128xi32>
      %58 = arith.addi %57, %53 : vector<16x128xi32>
      %59 = vector.broadcast %3 : i32 to vector<16x128xi32>
      %60 = arith.cmpi slt, %58, %59 : vector<16x128xi32>
      %cst_16 = arith.constant 0.000000e+00 : f32
      %61 = vector.broadcast %cst_16 : f32 to vector<16x128xf32>
      %62 = arith.select %60, %43, %61 : vector<16x128xi1>, vector<16x128xf32>
      %c0_17 = arith.constant 0 : index
      %c0_18 = arith.constant 0 : index
      %63 = vector.load %arg5[%c0_17, %c0_18] : memref<8x128xf32, #tpu.memory_space<vmem>>, vector<8x128xf32>
      %64 = vector.shape_cast %62 : vector<16x128xf32> to vector<2x8x128xf32>
      %cst_19 = arith.constant dense<0.000000e+00> : vector<8x128xf32>
      %65 = vector.multi_reduction <add>, %64, %cst_19 [0] : vector<2x8x128xf32> to vector<8x128xf32>
      %66 = arith.addf %63, %65 : vector<8x128xf32>
      %c0_20 = arith.constant 0 : index
      %c0_21 = arith.constant 0 : index
      %67 = vector.load %arg5[%c0_20, %c0_21] : memref<8x128xf32, #tpu.memory_space<vmem>>, vector<8x128xf32>
      tpu.vector_store %arg5[%c0_20, %c0_21], %66 {strides = array<i32>} : memref<8x128xf32, #tpu.memory_space<vmem>>, vector<8x128xf32>,
    } else {
    }
    %c1_i32_15 = arith.constant 1 : i32
    return
  }
  func.func @transform_0(%arg0: i32, %arg1: i32, %arg2: memref<1xi32, #tpu.memory_space<smem>>) -> (i32, i32) {
    %c1_i32 = arith.constant 1 : i32
    %0 = arith.muli %arg0, %c1_i32 : i32
    %1 = arith.addi %0, %arg1 : i32
    %c0_i32 = arith.constant 0 : i32
    %2 = arith.minsi %1, %c0_i32 : i32
    %c0_i32_0 = arith.constant 0 : i32
    %c0_i32_1 = arith.constant 0 : i32
    return %2, %c0_i32_0 : i32, i32
  }
  func.func @transform_1(%arg0: i32, %arg1: i32, %arg2: memref<1xi32, #tpu.memory_space<smem>>) -> (i32, i32) {
    %c1_i32 = arith.constant 1 : i32
    %0 = arith.muli %arg0, %c1_i32 : i32
    %1 = arith.addi %0, %arg1 : i32
    %c0_i32 = arith.constant 0 : i32
    %2 = arith.minsi %1, %c0_i32 : i32
    %c0_i32_0 = arith.constant 0 : i32
    %c0_i32_1 = arith.constant 0 : i32
    return %2, %c0_i32_0 : i32, i32
  }
  func.func @transform_2(%arg0: i32, %arg1: i32, %arg2: memref<1xi32, #tpu.memory_space<smem>>) -> (i32, i32) {
    %c0_i32 = arith.constant 0 : i32
    %c0_i32_0 = arith.constant 0 : i32
    return %arg0, %c0_i32 : i32, i32
  }
}

</mosaic_0001>

<bundles_post_ra>
// kernel: tpu_custom_call.1
= control target key start
LH: loop header
LB: loop body
LE: loop exit
PB: predicated region body
PF: predicated region fallthrough
CT: control target
= control target key end

     0   :  { %9 = vsyncpa [#allocation5], 0  ;;  %s367_s0 = inlined_call_operand.<no memory space> [shape: s32[1], index: 0, kind: input, shape index: {}]   ;;  %s368_s1 = inlined_call_operand.hbm [shape: f32[16,128], index: 1, kind: input, shape index: {}]   ;;  %s369_s2 = inlined_call_operand.hbm [shape: f32[16,128], index: 2, kind: input, shape index: {}]   ;;  %s370_s3 = inlined_call_operand.hbm [shape: f32[8,128], index: 3, kind: output, shape index: {}]  }
   0x1   :  { %10 = vsyncpa [#allocation8], 0 }
   0x2   :  { %11 = vsyncpa [#allocation6], 0  ;;  %s284_s12 = smov [#allocation4]   ;;  %s212_s16 = scalar_lea.hbm %s368_s1, 256 }
   0x3   :  { %s23_s13 = sshll.u32 %s284_s12, 4  ;;  %p213_p0 = scmp.ne.s32.totalorder %s368_s1, %s212_s16  ;;  %s24_s13 = int_to_ptr.vmem [resolvable:$true] %s23_s13 }
   0x4   :  { %p216_p1 = scmp.lt.u32.totalorder %s212_s16, %s368_s1 }
   0x6   :  { %p218_p2 = pnand %p216_p1, %p213_p0 }
   0x8   :  { %221 = shalt.err (!%p218_p2)
}
   0x9   :  { %s222_s21 = scalar_lea.vmem %s24_s13, 256  ;;  %p227_p4 = scmp.lt.s32.totalorder %s24_s13, %s24_s13 }
   0xa   :  { %p223_p3 = scmp.ne.s32.totalorder %s24_s13, %s222_s21  ;;  %p228_p5 = scmp.lt.s32.totalorder %s222_s21, %s222_s21 }
   0xc   :  { %p229_p6 = por %p228_p5, %p227_p4 }
   0xe   :  { %p230_p7 = pnand %p229_p6, %p223_p3 }
  0x10   :  { %233 = shalt.err (!%p230_p7)
}
  0x11   :  { %s285_s22 = smov 128   ;;  %s286_s23 = smov 8  }
  0x12   :  { %29 = dma.hbm_to_vmem [thread:$0]  %s368_s1, 256, %s24_s13, [#allocation5], %s285_s22, %s285_s22, %s286_s23  }
  0x13   :  { %s287_s26 = smov [#allocation7]   ;;  %s234_s30 = scalar_lea.hbm %s369_s2, 256 }
  0x14   :  { %s41_s27 = sshll.u32 %s287_s26, 4  ;;  %p235_p8 = scmp.ne.s32.totalorder %s369_s2, %s234_s30  ;;  %s42_s27 = int_to_ptr.vmem [resolvable:$true] %s41_s27 }
  0x15   :  { %p238_p9 = scmp.lt.u32.totalorder %s234_s30, %s369_s2 }
  0x17   :  { %p240_p10 = pnand %p238_p9, %p235_p8 }
  0x19   :  { %243 = shalt.err (!%p240_p10)
}
  0x1a   :  { %s244_s8 = scalar_lea.vmem %s42_s27, 256  ;;  %p249_p12 = scmp.lt.s32.totalorder %s42_s27, %s42_s27 }
  0x1b   :  { %p245_p11 = scmp.ne.s32.totalorder %s42_s27, %s244_s8  ;;  %p250_p13 = scmp.lt.s32.totalorder %s244_s8, %s244_s8 }
  0x1d   :  { %p251_p0 = por %p250_p13, %p249_p12 }
  0x1f   :  { %p252_p1 = pnand %p251_p0, %p245_p11 }
  0x21   :  { %255 = shalt.err (!%p252_p1)
}
  0x22   :  { %47 = dma.hbm_to_vmem [thread:$0]  %s369_s2, 256, %s42_s27, [#allocation8], %s285_s22, %s285_s22, %s286_s23  }
  0x23   :  { %278 = dma.done.wait [#allocation5], 256  }
  0x24   :  { %279 = vsyncadd [#allocation5], 4294967040 }
  0x25   :  { %280 = dma.done.wait [#allocation8], 256  }
  0x26   :  { %281 = vsyncadd [#allocation8], 4294967040  ;;  %v288_v0 = vmov 0.0   ;;  %v70_v1 = vld [vmem:[#allocation4] sm:$0xff]  ;;  %v71_v2 = vld [vmem:[#allocation4 + $0x8] sm:$0xff]  ;;  %p191_p2 = scmp.lt.s32.totalorder %s367_s0, 2048 }
  0x27   :  { %66 = vst [vmem:[#allocation9] sm:$0xff] %v288_v0  ;;  %v74_v3 = vand.u32 2147483647, %v70_v1  ;;  %v75_v4 = vand.u32 2147483647, %v71_v2  ;;  %v72_v15 = vld [vmem:[#allocation7] sm:$0xff] }
  0x28   :  { %v73_v17 = vld [vmem:[#allocation7 + $0x8] sm:$0xff]  ;;  %v92_v20 = vmax.f32 %v70_v1, 0.0  ;;  %v94_v21 = vmul.f32 %v72_v15, %v70_v1  ;;  %vm86_vm0 = vcmp.ge.f32.partialorder %v70_v1, 0.0  ;;  %vm87_vm1 = vcmp.ge.f32.partialorder %v71_v2, 0.0 }
  0x29   :  { %v76_v5 = vsub.f32 0.0, %v74_v3  ;;  %v77_v6 = vsub.f32 0.0, %v75_v4  ;;  %v93_v26 = vmax.f32 %v71_v2, 0.0  ;;  %v95_v27 = vmul.f32 %v73_v17, %v71_v2 }
  0x2a   :  { %v96_v35 = vsub.f32 %v92_v20, %v94_v21  ;;  %v130_v48 = vmul.f32 -0.5, %v72_v15  ;;  %v131_v50 = vmul.f32 -0.5, %v73_v17 }
  0x2b   :  { %v78_v7 = vmul.f32 1.442695, %v76_v5  ;;  %v80_v8 = vmul.f32 1.442695, %v77_v6  ;;  %v97_v42 = vsub.f32 %v93_v26, %v95_v27 }
  0x2c   :  { %v132_v56 = vadd.f32 0.75, %v130_v48  ;;  %v133_v58 = vadd.f32 0.75, %v131_v50 }
  0x2d   :  { %200 = vpow2.f32 %v78_v7 }
  0x2e   :  { %202 = vpow2.f32 %v80_v8  ;;  %v141_v63 = vld [vmem:[#allocation9] sm:$0xff] (!%p191_p2) }
  0x37   :  { %v201_v9 = vpop.eup %200 }
  0x38   :  { %v203_v10 = vpop.eup %202  ;;  %v82_v11 = vadd.f32 1.0, %v201_v9  ;;  %v101_v13 = vmul.f32 -0.5, %v201_v9  ;;  %v104_v18 = vand.u32 2147483647, %v201_v9 }
  0x39   :  { %v83_v12 = vadd.f32 1.0, %v203_v10  ;;  %v110_v14 = vmul.f32 -0.5, %v203_v10  ;;  %v113_v22 = vand.u32 2147483647, %v203_v10 }
  0x3a   :  { %204 = vrcp.f32 %v82_v11  ;;  %v102_v16 = vadd.f32 1.0, %v101_v13  ;;  %vm334_vm2 = vcmp.lt.f32.partialorder %v104_v18, 0.0004427343 }
  0x3b   :  { %206 = vrcp.f32 %v83_v12  ;;  %v111_v19 = vadd.f32 1.0, %v110_v14  ;;  %vm338_vm3 = vcmp.lt.f32.partialorder %v113_v22, 0.0004427343 }
  0x3c   :  { %208 = vlog2.f32 %v82_v11  ;;  %v103_v28 = vmul.f32 %v201_v9, %v102_v16 }
  0x3d   :  { %210 = vlog2.f32 %v83_v12  ;;  %v112_v32 = vmul.f32 %v203_v10, %v111_v19 }
  0x44   :  { %v205_v23 = vpop.eup %204 }
  0x45   :  { %v207_v24 = vpop.eup %206  ;;  %v88_v25 = vmul.f32 %v205_v23, %v201_v9 }
  0x46   :  { %v209_v29 = vpop.eup %208  ;;  %v89_v30 = vmul.f32 %v207_v24, %v203_v10 }
  0x47   :  { %v211_v33 = vpop.eup %210  ;;  %v90_v34 = vsel %vm86_vm0, %v205_v23, %v88_v25  ;;  %v100_v36 = vmul.f32 0.6931472, %v209_v29 }
  0x48   :  { %v91_v38 = vsel %vm87_vm1, %v207_v24, %v89_v30  ;;  %v109_v39 = vmul.f32 0.6931472, %v211_v33  ;;  %v118_v40 = vadd.f32 %v90_v34, %v72_v15  ;;  %v120_v41 = vmul.f32 2.0, %v90_v34 }
  0x49   :  { %v106_v43 = vsel %vm334_vm2, %v103_v28, %v100_v36  ;;  %v119_v44 = vadd.f32 %v91_v38, %v73_v17  ;;  %v121_v45 = vmul.f32 2.0, %v91_v38 }
  0x4a   :  { %v115_v46 = vsel %vm338_vm3, %v112_v32, %v109_v39  ;;  %v122_v47 = vmul.f32 %v120_v41, %v72_v15  ;;  %v116_v51 = vadd.f32 %v106_v43, %v96_v35 }
  0x4b   :  { %v123_v49 = vmul.f32 %v121_v45, %v73_v17  ;;  %v117_v53 = vadd.f32 %v115_v46, %v97_v42 }
  0x4c   :  { %v124_v52 = vsub.f32 %v118_v40, %v122_v47 }
  0x4d   :  { %v125_v54 = vsub.f32 %v119_v44, %v123_v49  ;;  %140 = sbr.rel (%p191_p2) target bundleno = 90 (0x5a), region = 25 }
  0x4e   :  { %v126_v55 = vmul.f32 %v124_v52, %v124_v52 }
  0x4f   :  { %v127_v57 = vmul.f32 %v125_v54, %v125_v54 }
  0x50   :  { %v128_v59 = vmul.f32 %v126_v55, %v116_v51 }
  0x51   :  { %v129_v60 = vmul.f32 %v127_v57, %v117_v53 }
  0x52   :  { %v134_v61 = vmul.f32 %v132_v56, %v128_v59 }
  0x53   :  { %v135_v62 = vmul.f32 %v133_v58, %v129_v60 }
  0x55   :  { %v142_v0 = vadd.f32 %v135_v62, %v134_v61 }
  0x57   :  { %v143_v1 = vadd.f32 %v142_v0, %v141_v63 }
  0x59   :  { %144 = vst [vmem:[#allocation9] sm:$0xff] %v143_v1 }
  0x5a PF:  { %p193_p3 = scmp.ge.s32.totalorder %s367_s0, 2048 }
  0x5b   :  { %v149_v2 = vlaneseq (!%p193_p3)  ;;  %v161_v7 = vstv (!%p193_p3), %s367_s0 }
  0x5c   :  { %148 = sbr.rel (%p193_p3) target bundleno = 108 (0x6c), region = 29 }
  0x5d   :  { %v150_v3 = vshrl.u32 (!%p193_p3), %v149_v2, 7  ;;  %v153_v4 = vand.u32 (!%p193_p3), 127, %v149_v2 }
  0x5f   :  { %v151_v5 = vadd.s32 (!%p193_p3), 8, %v150_v3  ;;  %v154_v6 = vmul.u32 (!%p193_p3), 128, %v150_v3 }
  0x60   :  { %v166_v13 = vld [vmem:[#allocation9] sm:$0xff] (!%p193_p3) }
  0x61   :  { %v155_v8 = vmul.u32 (!%p193_p3), 128, %v151_v5  ;;  %v159_v9 = vadd.s32 (!%p193_p3), %v154_v6, %v153_v4 }
  0x63   :  { %v160_v10 = vadd.s32 %v155_v8, %v153_v4  ;;  %vm162_vm4 = vcmp.lt.s32.totalorder %v159_v9, %v161_v7 }
  0x64   :  { %v164_v11 = vsel %vm162_vm4, %v134_v61, 0.0 }
  0x65   :  { %vm163_vm5 = vcmp.lt.s32.totalorder %v160_v10, %v161_v7 }
  0x66   :  { %v165_v12 = vsel %vm163_vm5, %v135_v62, 0.0 }
  0x67   :  { %v167_v14 = vadd.f32 %v165_v12, %v164_v11 }
  0x69   :  { %v168_v15 = vadd.f32 %v167_v14, %v166_v13 }
  0x6b   :  { %169 = vst [vmem:[#allocation9] sm:$0xff] %v168_v15 }
  0x6c PF:  { %s289_s15 = smov [#allocation9]  }
  0x6d   :  { %s176_s16 = sshll.u32 %s289_s15, 4  ;;  %s177_s16 = int_to_ptr.vmem [resolvable:$true] %s176_s16 }
  0x6e   :  { %s256_s17 = scalar_lea.vmem %s177_s16, 128  ;;  %p261_p5 = scmp.lt.s32.totalorder %s177_s16, %s177_s16 }
  0x6f   :  { %p257_p4 = scmp.ne.s32.totalorder %s177_s16, %s256_s17  ;;  %p262_p6 = scmp.lt.s32.totalorder %s256_s17, %s256_s17 }
  0x71   :  { %p263_p7 = por %p262_p6, %p261_p5 }
  0x73   :  { %p264_p8 = pnand %p263_p7, %p257_p4 }
  0x75   :  { %267 = shalt.err (!%p264_p8)
}
  0x76   :  { %s268_s19 = scalar_lea.hbm %s370_s3, 128 }
  0x77   :  { %p269_p9 = scmp.ne.s32.totalorder %s370_s3, %s268_s19  ;;  %p272_p10 = scmp.lt.u32.totalorder %s268_s19, %s370_s3 }
  0x79   :  { %p274_p11 = pnand %p272_p10, %p269_p9 }
  0x7b   :  { %277 = shalt.err (!%p274_p11)
}
  0x7c   :  { %179 = dma.vmem_to_hbm [thread:$0]  %s177_s16, 128, %s370_s3, [#allocation6]  }
  0x7d   :  { %282 = dma.done.wait [#allocation6], 128  }
  0x7e   :  { %283 = vsyncadd [#allocation6], 4294967168 }
  0x7f   :  { %183 = vsyncpa [#allocation5], 1 }
  0x80   :  { %184 = vsyncpa [#allocation8], 1 }
  0x81   :  { %185 = vsyncpa [#allocation6], 1 }

</bundles_post_ra>
